<compile_context>
chip_gen: v7x
topology: tpu7x:2x2x1
jax: 0.10.0
libtpu: 0.0.40
codegen_flags: <defaults>
</compile_context>

<pallas_src>
import functools

import jax
import jax.numpy as jnp
from jax import lax
from jax.experimental import pallas as pl
from jax.experimental.pallas import tpu as pltpu


# ----------------------------------------------------------------------------
# Kernel 1: fused Q/K/V 1x1 conv in NCHW layout
#   out[b, :, s_tile] = W_fused (3OC, C) @ x[b, :, s_tile] (C, ts) + bias
# ----------------------------------------------------------------------------
def _qkv_conv_kernel(x_ref, w_ref, b_ref, o_ref):
    # x_ref: (1, C, ts), w_ref: (3OC, C), b_ref: (3OC, 1), o_ref: (1, 3OC, ts)
    o_ref[0] = (
        jnp.dot(w_ref[...], x_ref[0], preferred_element_type=jnp.float32)
        + b_ref[...]
    )


def qkv_conv(x_bcs, w_fused, b_fused, *, max_spatial_tile=2048):
    """x_bcs: (B, C, S) f32, w_fused: (3OC, C), b_fused: (3OC, 1) -> (B, 3OC, S)."""
    B, C, S = x_bcs.shape
    OC3 = w_fused.shape[0]
    # Lane-dense spatial tile: multiple of 128 when S allows it, else full S.
    ts = min(S, max_spatial_tile) if (S % 128 == 0) else S
    grid = (B, pl.cdiv(S, ts))
    return pl.pallas_call(
        _qkv_conv_kernel,
        out_shape=jax.ShapeDtypeStruct((B, OC3, S), jnp.float32),
        grid=grid,
        in_specs=[
            pl.BlockSpec((1, C, ts), lambda b, s: (b, 0, s)),
            pl.BlockSpec((OC3, C), lambda b, s: (0, 0)),
            pl.BlockSpec((OC3, 1), lambda b, s: (0, 0)),
        ],
        out_specs=pl.BlockSpec((1, OC3, ts), lambda b, s: (b, 0, s)),
        compiler_params=pltpu.CompilerParams(
            dimension_semantics=("parallel", "parallel")),
    )(x_bcs, w_fused, b_fused)


# ----------------------------------------------------------------------------
# Kernel 2: complex attention in the Fourier domain (all batches in one step)
#   s[b,n,m]   = sum_c q[b,c,n] * k[b,c,m]                      (complex)
#   s          = softmax(|s|, -1) * exp(i*angle(s))
#   out[b,c,n] = sum_m s[b,n,m] * v[b,c,m]                      (complex)
# Inputs: real/imag planes of the stacked Q|K|V spectrum, layout (B, 3*OC, N).
# Outputs: (B, OC, N) real + imag, which is exactly the layout irfft2 wants.
# ----------------------------------------------------------------------------
def _spectral_attn_kernel(oc, qkvr_ref, qkvi_ref, or_ref, oi_ref):
    qkv_r = qkvr_ref[...]                     # (B, 3OC, N)
    qkv_i = qkvi_ref[...]
    qr, kr, vr = qkv_r[:, :oc], qkv_r[:, oc:2 * oc], qkv_r[:, 2 * oc:]
    qi, ki, vi = qkv_i[:, :oc], qkv_i[:, oc:2 * oc], qkv_i[:, 2 * oc:]

    # s = q^H-free complex matmul — Karatsuba: 3 MXU passes instead of 4.
    t1 = jnp.einsum('bcn,bcm->bnm', qr, kr, preferred_element_type=jnp.float32)
    t2 = jnp.einsum('bcn,bcm->bnm', qi, ki, preferred_element_type=jnp.float32)
    t3 = jnp.einsum('bcn,bcm->bnm', qr + qi, kr + ki,
                    preferred_element_type=jnp.float32)
    sr = t1 - t2
    si = t3 - t1 - t2

    # ComplexSoftmax(use_phase=True): softmax(|s|, dim=-1) * exp(i * angle(s)).
    # Phase via one EUP rsqrt instead of sqrt + two divides; angle(0) := 0.
    mag2 = sr * sr + si * si
    nonzero = mag2 > 0.0
    inv_mag = lax.rsqrt(jnp.where(nonzero, mag2, 1.0))        # EUP
    mag = mag2 * inv_mag                                      # == |s| (0 at s==0)
    cos_a = jnp.where(nonzero, sr * inv_mag, 1.0)
    sin_a = jnp.where(nonzero, si * inv_mag, 0.0)

    m = jnp.max(mag, axis=-1, keepdims=True)
    p = jnp.exp(mag - m)
    sm = p * pl.reciprocal(jnp.sum(p, axis=-1, keepdims=True), approx=True)

    ar = sm * cos_a
    ai = sm * sin_a

    # out[b,c,n] = sum_m v[b,c,m] * a[b,n,m]  (complex) — Karatsuba again.
    u1 = jnp.einsum('bcm,bnm->bcn', vr, ar, preferred_element_type=jnp.float32)
    u2 = jnp.einsum('bcm,bnm->bcn', vi, ai, preferred_element_type=jnp.float32)
    u3 = jnp.einsum('bcm,bnm->bcn', vr + vi, ar + ai,
                    preferred_element_type=jnp.float32)
    or_ref[...] = u1 - u2
    oi_ref[...] = u3 - u1 - u2


def spectral_attn(qkv_r, qkv_i, oc):
    """qkv_r/qkv_i: (B, 3*OC, N) f32 -> (out_r, out_i): (B, OC, N) f32.

    All batches in a single grid step: at these sizes the kernel is launch /
    DMA-setup dominated, so one fat step beats a grid=(B,) loop.  (For large B
    or large N = modes1*modes2, re-introduce a batch grid axis and a
    flash-style tiled softmax to bound the (N, N) intermediates in VMEM.)
    """
    B, OC3, N = qkv_r.shape
    spec_in = pl.BlockSpec((B, OC3, N), lambda: (0, 0, 0))
    spec_out = pl.BlockSpec((B, oc, N), lambda: (0, 0, 0))
    return pl.pallas_call(
        functools.partial(_spectral_attn_kernel, oc),
        out_shape=(jax.ShapeDtypeStruct((B, oc, N), jnp.float32),
                   jax.ShapeDtypeStruct((B, oc, N), jnp.float32)),
        in_specs=[spec_in, spec_in],
        out_specs=(spec_out, spec_out),
    )(qkv_r, qkv_i)


# ----------------------------------------------------------------------------
# Full forward pass (glue in plain JAX, hot paths in Pallas)
# ----------------------------------------------------------------------------
def spectral_attention_forward(x, params, modes1, modes2):
    """x: (B, C, W, H) float32 (NCHW, matching PyTorch)."""
    B, C, W, H = x.shape
    OC = params["wq"].shape[0]
    S = W * H

    # Fused Q/K/V weights: (3*OC, C) and bias (3*OC, 1).
    w_fused = jnp.concatenate(
        [params["wq"].reshape(OC, C),
         params["wk"].reshape(OC, C),
         params["wv"].reshape(OC, C)], axis=0)
    b_fused = jnp.concatenate(
        [params["bq"], params["bk"], params["bv"]], axis=0)[:, None]

    # Fused 1x1 conv directly in NCHW — no activation transposes.
    qkv = qkv_conv(x.reshape(B, C, S), w_fused, b_fused)        # (B, 3OC, S)

    # TODO(synk): FFT has no Pallas primitive; rfft2/irfft2 done with jnp.fft.
    # One FFT over the stacked Q|K|V channel axis instead of three separate ones.
    qkv_ft = jnp.fft.rfft2(qkv.reshape(B, 3 * OC, W, H))[:, :, :modes1, :modes2]
    f1, f2 = qkv_ft.shape[2], qkv_ft.shape[3]
    N = f1 * f2
    qkv_ft = qkv_ft.reshape(B, 3 * OC, N)                       # natural layout

    out_r, out_i = spectral_attn(
        jnp.real(qkv_ft).astype(jnp.float32),
        jnp.imag(qkv_ft).astype(jnp.float32),
        OC)

    # Attention output is already (B, OC, N) — reshape straight into the
    # spectrum layout irfft2 expects (truncate-then-zero-pad semantics of
    # irfft2 with s=(W, H) match torch).
    attended_ft = (out_r + 1j * out_i).astype(jnp.complex64).reshape(B, OC, f1, f2)
    attended = jnp.fft.irfft2(attended_ft, s=(W, H))             # (B, OC, W, H)
    return attended.astype(jnp.float32)


# ----------------------------------------------------------------------------
# Deterministic parameter init + run
# ----------------------------------------------------------------------------
def init_params(key, in_channels, out_channels):
    ks = jax.random.split(key, 6)
    scale = 1.0 / jnp.sqrt(in_channels)
    def w(k): return jax.random.uniform(
        k, (out_channels, in_channels, 1, 1), jnp.float32, -scale, scale)
    def b(k): return jax.random.uniform(
        k, (out_channels,), jnp.float32, -scale, scale)
    return {
        "wq": w(ks[0]), "bq": b(ks[1]),
        "wk": w(ks[2]), "bk": b(ks[3]),
        "wv": w(ks[4]), "bv": b(ks[5]),
    }


if __name__ == "__main__":
    B, C, OC = 2, 4, 4
    W, H = 16, 16
    modes1, modes2 = 8, 8   # must be <= W and <= H//2 + 1

    key = jax.random.PRNGKey(0)
    kx, kp = jax.random.split(key)
    x = jax.random.normal(kx, (B, C, W, H), jnp.float32)
    params = init_params(kp, C, OC)

    out = spectral_attention_forward(x, params, modes1, modes2)
    out = jax.block_until_ready(out)
    assert out.shape == (B, OC, W, H), out.shape
    assert jnp.all(jnp.isfinite(out))
    print("KERNEL_OK")
</pallas_src>

<mosaic_0001>
module attributes {stable_mosaic.version = 11 : i64} {
  func.func @_qkv_conv_kernel(%arg0: i32, %arg1: i32, %arg2: memref<1x4x256xf32, #tpu.memory_space<vmem>>, %arg3: memref<12x4xf32, #tpu.memory_space<vmem>>, %arg4: memref<12x1xf32, #tpu.memory_space<vmem>>, %arg5: memref<1x12x256xf32, #tpu.memory_space<vmem>>) attributes {dimension_semantics = [#tpu.dimension_semantics<parallel>, #tpu.dimension_semantics<parallel>], iteration_bounds = array<i64: 2, 1>, scalar_prefetch = 0 : i64, scratch_operands = 0 : i64, tpu.core_type = #tpu.core_type<tc>, window_params = [{transform_indices = @transform_0, window_bounds = array<i64: 1, 4, 256>}, {pipeline_mode = #tpu.pipeline_mode<synchronous>, transform_indices = @transform_1, window_bounds = array<i64: 12, 4>}, {pipeline_mode = #tpu.pipeline_mode<synchronous>, transform_indices = @transform_2, window_bounds = array<i64: 12, 1>}, {transform_indices = @transform_3, window_bounds = array<i64: 1, 12, 256>}]} {
    %c0 = arith.constant 0 : index
    %c0_0 = arith.constant 0 : index
    %0 = vector.load %arg3[%c0, %c0_0] : memref<12x4xf32, #tpu.memory_space<vmem>>, vector<12x4xf32>
    %c0_1 = arith.constant 0 : index
    %c0_2 = arith.constant 0 : index
    %c0_3 = arith.constant 0 : index
    %1 = vector.load %arg2[%c0_1, %c0_2, %c0_3] : memref<1x4x256xf32, #tpu.memory_space<vmem>>, vector<1x4x256xf32>
    %2 = vector.shape_cast %1 : vector<1x4x256xf32> to vector<4x256xf32>
    %cst = arith.constant dense<0.000000e+00> : vector<12x256xf32>
    %3 = tpu.matmul %0, %2, %cst {dimension_numbers = #tpu.dot_dimension_numbers<[1], [0], [0], [1], [0, 0, 1, 1], [], []>} : vector<12x4xf32>, vector<4x256xf32>, vector<12x256xf32> -> vector<12x256xf32>
    %c0_4 = arith.constant 0 : index
    %c0_5 = arith.constant 0 : index
    %4 = vector.load %arg4[%c0_4, %c0_5] : memref<12x1xf32, #tpu.memory_space<vmem>>, vector<12x1xf32>
    %5 = vector.broadcast %4 : vector<12x1xf32> to vector<12x256xf32>
    %6 = arith.addf %3, %5 : vector<12x256xf32>
    %c0_6 = arith.constant 0 : index
    %c0_7 = arith.constant 0 : index
    %c0_8 = arith.constant 0 : index
    %7 = vector.load %arg5[%c0_6, %c0_7, %c0_8] : memref<1x12x256xf32, #tpu.memory_space<vmem>>, vector<1x12x256xf32>
    %8 = vector.shape_cast %7 : vector<1x12x256xf32> to vector<12x256xf32>
    %9 = vector.shape_cast %6 : vector<12x256xf32> to vector<1x12x256xf32>
    tpu.vector_store %arg5[%c0_6, %c0_7, %c0_8], %9 {strides = array<i32>} : memref<1x12x256xf32, #tpu.memory_space<vmem>>, vector<1x12x256xf32>,
    return
  }
  func.func @transform_0(%arg0: i32, %arg1: i32) -> (i32, i32, i32) {
    %c0_i32 = arith.constant 0 : i32
    %c0_i32_0 = arith.constant 0 : i32
    return %arg0, %c0_i32, %arg1 : i32, i32, i32
  }
  func.func @transform_1(%arg0: i32, %arg1: i32) -> (i32, i32) {
    %c0_i32 = arith.constant 0 : i32
    %c0_i32_0 = arith.constant 0 : i32
    %c0_i32_1 = arith.constant 0 : i32
    return %c0_i32, %c0_i32_0 : i32, i32
  }
  func.func @transform_2(%arg0: i32, %arg1: i32) -> (i32, i32) {
    %c0_i32 = arith.constant 0 : i32
    %c0_i32_0 = arith.constant 0 : i32
    %c0_i32_1 = arith.constant 0 : i32
    return %c0_i32, %c0_i32_0 : i32, i32
  }
  func.func @transform_3(%arg0: i32, %arg1: i32) -> (i32, i32, i32) {
    %c0_i32 = arith.constant 0 : i32
    %c0_i32_0 = arith.constant 0 : i32
    return %arg0, %c0_i32, %arg1 : i32, i32, i32
  }
}

</mosaic_0001>

<bundles_post_ra>
// kernel: tpu_custom_call.1
= control target key start
LH: loop header
LB: loop body
LE: loop exit
PB: predicated region body
PF: predicated region fallthrough
CT: control target
= control target key end

     0   :  { %s500_s12 = smov 0   ;;  %s502_s13 = smov 0   ;;  %s545_s0 = inlined_call_operand.vmem [shape: f32[2,4,256], index: 0, kind: input, shape index: {}]   ;;  %s546_s1 = inlined_call_operand.vmem [shape: f32[12,4], index: 1, kind: input, shape index: {}]   ;;  %s547_s2 = inlined_call_operand.vmem [shape: f32[12,1], index: 2, kind: input, shape index: {}]   ;;  %s548_s3 = inlined_call_operand.vmem [shape: f32[2,12,256], index: 3, kind: output, shape index: {}]  }
   0x1   :  { %s504_s14 = smov 0  }
   0x2 LB: > { %s25_s15 = sadd.s32 1, %s472_s13  ;;  %p411_p0 = scmp.ge.s32.totalorder %s476_s14, 1  ;;  %s476_s14 = sphi %s504_s14, %s13_s14   ;;  %s472_s13 = sphi %s502_s13, %s550_s13   ;;  %s468_s12 = sphi %s500_s12, %s549_s12  }
   0x3   : > { %p27_p1 = scmp.ge.s32.totalorder %s25_s15, 2  ;;  %p158_p2 = scmp.lt.s32.totalorder %s476_s14, 3 }
   0x5   : > { %s552_s15 = smov (%p27_p1, %s25_s15), 0  ;;  %p159_p3 = pnand %p411_p0, %p158_p2 }
   0x6   : > { %p191_p4 = scmp.lt.s32.totalorder (!%p159_p3), %s468_s12, 1  ;;  %v478_v0 = vmov (!%p159_p3), 0.0   ;;  %v213_v1 = vld [vmem:[%s547_s2] sm:$0xff] (!%p159_p3)  ;;  %v479_v2 = vmov (!%p159_p3), 0   ;;  %v214_v3 = vld [vmem:[%s547_s2 + $0x8] sm:$0xf] (!%p159_p3) }
   0x7   : > { %162 = sbr.rel (%p159_p3) target bundleno = 238 (0xee), region = 32  ;;  %303 = vmatprep.mubr.f32.mxu0 (!%p159_p3), %v478_v0  ;;  %309 = vmatprep.mubr.f32.mxu1 (!%p159_p3), %v478_v0  ;;  %vm234_vm0 = vcmask (!%p159_p3), 1043456   ;;  %v210_v6 = vld [vmem:[%s546_s1] sm:$0xff] (!%p159_p3)  ;;  %vm227_vm1 = vcmask (!%p159_p3), 31744   ;;  %v211_v7 = vld [vmem:[%s546_s1 + $0x8] sm:$0xf] (!%p159_p3) }
   0x8   : > { %452 = vset.pattern.permute.xlu0 (!%p159_p3), %v479_v2 }
   0x9   : > { %217 = vperm.xlu0 (!%p159_p3), %452, %v213_v1  }
   0xd   : > { %222 = vperm.xlu0 (!%p159_p3), %452, %v214_v3  }
   0xe   : > { %s554_s12 = smov (!%p191_p4, %s468_s12), 1 }
   0xf   : > { %s422_s18 = sshll.u32 %s554_s12, 3  ;;  %s423_s28 = sshll.u32 %s554_s12, 5 }
  0x10   : > { %s198_s23 = scalar_lea.vmem %s545_s0, %s422_s18  ;;  %s208_s4 = scalar_lea.vmem %s548_s3, %s423_s28 }
  0x11   : > { %v212_v4 = vld [vmem:[%s198_s23] sm:$0xff] }
  0x12   : > { %v226_v5 = vcombine.high %v212_v4, %v212_v4 }
  0x14   : > { %416 = vmatprep.subr.msk.mxu0 %vm234_vm0, %v226_v5  ;;  %424 = vmatprep.subr.msk.mxu1 %vm234_vm0, %v226_v5 }
  0x15   : > { %417 = vmatpush1.msk.msra.mxu0 %vm234_vm0, %v212_v4  ;;  %425 = vmatpush1.msk.msra.mxu1 %vm234_vm0, %v212_v4 }
  0x16   : > { %418 = vmatmul.mubr.msk.f32.vlgmr.msra.gmra.mrb[0].mxu0 %vm227_vm1, %v210_v6  ;;  %419 = vmatmul.mubr.msk.f32.vlgmr.msra.gmra.mrb[0].mxu1 %vm227_vm1, %v211_v7 }
  0x88   : > { %v218_v8 = vpop.permute.xlu0 %217 }
  0x8c   : > { %v223_v9 = vpop.permute.xlu0 %222 }
  0xe9   : > { %v305_v10 = vpop.f32.mrb[0].mxu0  ;;  %v311_v11 = vpop.f32.mrb[0].mxu1 }
  0xea   : > { %v306_v12 = vadd.f32 %v305_v10, %v218_v8  ;;  %v312_v13 = vadd.f32 %v311_v11, %v223_v9  ;;  %v307_v14 = vpop.f32.mrb[1].mxu0  ;;  %v313_v15 = vpop.f32.mrb[1].mxu1 }
  0xeb   : > { %v308_v16 = vadd.f32 %v307_v14, %v218_v8  ;;  %v314_v17 = vadd.f32 %v313_v15, %v223_v9 }
  0xec   : > { %316 = vst [vmem:[%s208_s4] sm:$0xff] %v306_v12  ;;  %318 = vst [vmem:[%s208_s4 + $0x10] sm:$0xf] %v312_v13 }
  0xed   : > { %317 = vst [vmem:[%s208_s4 + $0x8] sm:$0xff] %v308_v16  ;;  %319 = vst [vmem:[%s208_s4 + $0x18] sm:$0xf] %v314_v17 }
  0xee PF: > { %s13_s14 = sadd.s32 1, %s476_s14   ;;  %s549_s12 = smov %s472_s13 }
  0xef   : > { %p10_p5 = scmp.ge.s32.totalorder %s13_s14, 4   ;;  %s550_s13 = smov %s552_s15 }
  0xf1   :  { %12 = sbr.rel (!%p10_p5) target bundleno = 2 (0x2), region = 62 }

</bundles_post_ra>
